<compile_context>
chip_gen: v5e
topology: v5e:2x2
jax: 0.10.0
libtpu: 0.0.40
codegen_flags: <defaults>
</compile_context>

<pallas_src>
import functools

import jax
import jax.numpy as jnp
import numpy as np
from jax.experimental import pallas as pl
from jax.experimental.pallas import tpu as pltpu

BN_EPS = 1e-5
LANE = 128                        # pad K and OC up to multiples of this
SUBLANE = 16                      # bf16 sublane packing; M tiles are multiples of this
TM_TARGET = 1024                  # rows per grid step (amortizes ~0.35us/step; ~86% HBM roofline)
VMEM_LIMIT = 32 * 1024 * 1024     # explicit scoped-VMEM budget; safe on v5e/v6e (128 MiB) and v7x (64 MiB)


def _round_up(x, m):
    return (x + m - 1) // m * m


def _choose_m_tiling(m):
    """Sublane-aligned M tile, >=2 grid steps whenever M allows it (so both v7x TensorCores
    run under dimension_semantics=('parallel',)), capped at TM_TARGET."""
    mp = _round_up(m, SUBLANE)
    tm = min(TM_TARGET, max(SUBLANE, _round_up(-(-mp // 2), SUBLANE)))
    mp = _round_up(m, tm)
    return tm, mp, mp // tm


# ---------------------------------------------------------------------------
# Pallas kernels
# ---------------------------------------------------------------------------
def _matmul_stats_kernel(p_ref, w_ref, y_ref, sum_ref, sq_ref):
    """Pass 1: Y = P @ W on the MXU (bf16 in, f32 acc); per-tile column sum / sumsq in f32;
    Y written back tile-mean-centred in bf16."""
    y = jnp.dot(p_ref[...], w_ref[...], preferred_element_type=jnp.float32)   # [TM, OCp] f32
    col_sum = jnp.sum(y, axis=0, keepdims=True)                               # [1, OCp] f32
    sum_ref[...] = col_sum.reshape(sum_ref.shape)
    sq_ref[...] = jnp.sum(y * y, axis=0, keepdims=True).reshape(sq_ref.shape)
    tile_mean = col_sum * (1.0 / y.shape[0])
    y_ref[...] = (y - tile_mean).astype(y_ref.dtype)


def _make_norm_kernel(has_residual):
    """Pass 2: (y + tile_mean)*scale + shift (+ residual), then per-column ReLU floor."""
    if has_residual:
        def kernel(y_ref, tmean_ref, scale_ref, shift_ref, floor_ref, r_ref, o_ref):
            y = y_ref[...].astype(jnp.float32) + tmean_ref[0]
            out = y * scale_ref[...] + shift_ref[...] + r_ref[...].astype(jnp.float32)
            o_ref[...] = jnp.maximum(out, floor_ref[...]).astype(o_ref.dtype)
    else:
        def kernel(y_ref, tmean_ref, scale_ref, shift_ref, floor_ref, o_ref):
            y = y_ref[...].astype(jnp.float32) + tmean_ref[0]
            out = y * scale_ref[...] + shift_ref[...]
            o_ref[...] = jnp.maximum(out, floor_ref[...]).astype(o_ref.dtype)
    return kernel


def conv_bn_pallas(patches, w_mat, gamma, beta, *, residual=None, n_relu=0,
                   out_dtype=jnp.float32):
    """Fused conv (im2col matmul) + training-mode BatchNorm (+ residual) (+ per-column ReLU).

    patches : [M, K]        w_mat : [K, OC]       gamma/beta : broadcastable to [OC]
    residual: optional [M, C<=OCp]                n_relu: ReLU on columns [0, n_relu)
    Returns [M, OCp] in out_dtype with OCp = round_up(OC, 128); padded columns are exactly 0.
    """
    M, K = patches.shape
    OC = w_mat.shape[1]
    Kp = _round_up(K, LANE)
    OCp = _round_up(OC, LANE)
    TM, Mp, nt = _choose_m_tiling(M)

    # Operand prep: bf16 MXU operands, zero-padded (padded rows/cols contribute 0 to the
    # stats; the divisor below is the real M, so the statistics stay exact).
    p = jnp.pad(patches.astype(jnp.bfloat16), ((0, Mp - M), (0, Kp - K)))
    w = jnp.pad(w_mat.astype(jnp.float32), ((0, Kp - K), (0, OCp - OC))).astype(jnp.bfloat16)
    g = jnp.pad(jnp.reshape(gamma, (-1,)).astype(jnp.float32), (0, OCp - OC))
    b = jnp.pad(jnp.reshape(beta, (-1,)).astype(jnp.float32), (0, OCp - OC))

    # --- pass 1: tiled matmul + per-tile partial stats; Y stored centred in bf16 ----------
    cost1 = pl.CostEstimate(
        flops=2 * Mp * Kp * OCp + 5 * Mp * OCp,
        transcendentals=0,
        bytes_accessed=Mp * Kp * 2 + Kp * OCp * 2 + Mp * OCp * 2 + 2 * nt * OCp * 4)
    y, tsum, tsq = pl.pallas_call(
        _matmul_stats_kernel,
        out_shape=(jax.ShapeDtypeStruct((Mp, OCp), jnp.bfloat16),
                   jax.ShapeDtypeStruct((nt, 1, OCp), jnp.float32),
                   jax.ShapeDtypeStruct((nt, 1, OCp), jnp.float32)),
        grid=(nt,),
        in_specs=[pl.BlockSpec((TM, Kp), lambda i: (i, 0)),
                  pl.BlockSpec((Kp, OCp), lambda i: (0, 0))],      # weight stays resident
        out_specs=(pl.BlockSpec((TM, OCp), lambda i: (i, 0)),
                   pl.BlockSpec((1, 1, OCp), lambda i: (i, 0, 0)),
                   pl.BlockSpec((1, 1, OCp), lambda i: (i, 0, 0))),
        compiler_params=pltpu.CompilerParams(
            dimension_semantics=("parallel",),
            vmem_limit_bytes=VMEM_LIMIT),
        cost_estimate=cost1,
    )(p, w)

    # --- host: global BN stats (over real M rows) folded into scale/shift -----------------
    # NOTE: E[x^2]-E[x]^2 in f32 is adequate at these mean/std ratios; move to a shifted /
    #       Welford tile-combine if |mean| >> std (deep stacks, large init_mu_post).
    s = jnp.sum(tsum, axis=(0, 1))                 # [OCp]
    ss = jnp.sum(tsq, axis=(0, 1))                 # [OCp]
    inv_m = jnp.float32(1.0 / M)
    mean = s * inv_m
    var = jnp.maximum(ss * inv_m - mean * mean, 0.0)
    scale = g * jax.lax.rsqrt(var + BN_EPS)        # gamma * rsqrt(var+eps)
    shift = b - mean * scale                       # beta - mean*scale
    scale2 = scale.reshape(1, OCp)
    shift2 = shift.reshape(1, OCp)
    tmean = tsum * jnp.float32(1.0 / TM)           # exactly what pass 1 subtracted per tile
    floor = jnp.where(jnp.arange(OCp) < n_relu, 0.0,
                      jnp.finfo(jnp.float32).min).astype(jnp.float32).reshape(1, OCp)

    # --- pass 2: tiled normalize (+ residual) (+ per-column ReLU) --------------------------
    inputs = [y, tmean, scale2, shift2, floor]
    in_specs = [pl.BlockSpec((TM, OCp), lambda i: (i, 0)),
                pl.BlockSpec((1, 1, OCp), lambda i: (i, 0, 0)),
                pl.BlockSpec((1, OCp), lambda i: (0, 0)),
                pl.BlockSpec((1, OCp), lambda i: (0, 0)),
                pl.BlockSpec((1, OCp), lambda i: (0, 0))]
    has_res = residual is not None
    if has_res:
        r = jnp.pad(residual, ((0, Mp - residual.shape[0]), (0, OCp - residual.shape[1])))
        inputs.append(r)
        in_specs.append(pl.BlockSpec((TM, OCp), lambda i: (i, 0)))

    out_bytes = Mp * OCp * jnp.dtype(out_dtype).itemsize
    cost2 = pl.CostEstimate(
        flops=(4 + int(has_res)) * Mp * OCp,
        transcendentals=0,
        bytes_accessed=Mp * OCp * 2 * (1 + int(has_res)) + out_bytes)
    out = pl.pallas_call(
        _make_norm_kernel(has_res),
        out_shape=jax.ShapeDtypeStruct((Mp, OCp), out_dtype),
        grid=(nt,),
        in_specs=in_specs,
        out_specs=pl.BlockSpec((TM, OCp), lambda i: (i, 0)),
        compiler_params=pltpu.CompilerParams(
            dimension_semantics=("parallel",),
            vmem_limit_bytes=VMEM_LIMIT),
        cost_estimate=cost2,
    )(*inputs)
    # Padded rows (M..Mp) carry garbage ('shift'); slice them off here and never reuse them.
    return out[:M]


# ---------------------------------------------------------------------------
# Host-side glue: NHWC im2col, weight layout, Bayesian weight sampling
# ---------------------------------------------------------------------------
def im2col_nhwc(x_nhwc, ks, stride, pad):
    """x: [B, H, W, C] -> patches [B*OH*OW, ks*ks*C], K index = (kh*ks + kw)*C + c."""
    B, H, W, C = x_nhwc.shape
    xp = jnp.pad(x_nhwc, ((0, 0), (pad, pad), (pad, pad), (0, 0)))
    OH = (H + 2 * pad - ks) // stride + 1
    OW = (W + 2 * pad - ks) // stride + 1
    taps = []
    for kh in range(ks):
        for kw in range(ks):
            taps.append(xp[:, kh:kh + (OH - 1) * stride + 1:stride,
                           kw:kw + (OW - 1) * stride + 1:stride, :])   # [B,OH,OW,C]
    patches = jnp.concatenate(taps, axis=-1)        # [B, OH, OW, ks*ks*C]
    return patches.reshape(B * OH * OW, ks * ks * C), OH, OW


def w_to_mat_khwc(w_oihw):
    """OIHW conv weight -> [KH*KW*IC, OC], K ordered (kh, kw, c) to match im2col_nhwc."""
    w = jnp.transpose(w_oihw, (2, 3, 1, 0))         # [KH, KW, IC, OC]
    return w.reshape(-1, w_oihw.shape[0])


def sample_convbnn_weight(key, oc, ic, ks, init_type, dist_params):
    """ConvBnn: w = mu + softplus(rho) * eps, sampled once (deterministic key)."""
    k_mu, k_eps = jax.random.split(key)
    shape = (oc, ic, ks, ks)
    if init_type == "normal":
        mu = dist_params["init_mu_post"] + 0.1 * jax.random.normal(k_mu, shape, jnp.float32)
    else:  # 'fixed'
        mu = jnp.full(shape, dist_params["init_mu_post"], jnp.float32)
    rho = jnp.full(shape, dist_params["init_rho_post"], jnp.float32)
    eps = jax.random.normal(k_eps, shape, jnp.float32)
    return mu + jnp.log1p(jnp.exp(rho)) * eps        # [OC, IC, KH, KW]


def resnet_bloc_forward(x_nchw, params, stride, ks, conv_in_identity):
    """Full ResnetBloc forward (conv weights already sampled). Input/output NCHW."""
    B, IC, H, W = x_nchw.shape
    OC = params["w1"].shape[0]
    pad = 1                                          # module hardcodes padding=1
    x = jnp.transpose(x_nchw, (0, 2, 3, 1)).astype(jnp.bfloat16)   # NHWC + bf16, once

    # 1x1 stride-2 pad-0 conv samples exactly the centre tap of an odd-ks stride-2 conv with
    # pad == ks//2, so the identity branch can ride along in the stage-1 matmul.
    fuse_identity = conv_in_identity and stride == 2 and ks % 2 == 1 and pad == ks // 2

    # --- stage 1: conv(ks, stride, pad=1) -> BN -> ReLU   (+ fused identity conv -> BN) ---
    p1, OH1, OW1 = im2col_nhwc(x, ks, stride, pad)   # [M1, ks*ks*IC] bf16
    w1_mat = w_to_mat_khwc(params["w1"])             # [ks*ks*IC, OC]
    if fuse_identity:
        ct = (ks // 2) * ks + (ks // 2)              # centre tap (kh=ks//2, kw=ks//2)
        w_id_emb = jnp.zeros((ks * ks * IC, OC), jnp.float32)
        w_id_emb = w_id_emb.at[ct * IC:(ct + 1) * IC, :].set(
            jnp.transpose(params["w_id"][:, :, 0, 0], (1, 0)))      # [IC, OC]
        w_mat = jnp.concatenate([w1_mat, w_id_emb], axis=1)         # [K1, 2*OC]
        gamma = jnp.concatenate([params["g1"].reshape(-1), params["g_id"].reshape(-1)])
        beta = jnp.concatenate([params["b1"].reshape(-1), params["b_id"].reshape(-1)])
        s1 = conv_bn_pallas(p1, w_mat, gamma, beta, n_relu=OC, out_dtype=jnp.bfloat16)
        y1_rows = s1[:, :OC]                         # relu(BN1(conv1))
        id_out = s1[:, OC:2 * OC]                    # BN_id(conv_id), no ReLU
    else:
        y1_rows = conv_bn_pallas(p1, w1_mat, params["g1"], params["b1"],
                                 n_relu=OC, out_dtype=jnp.bfloat16)[:, :OC]
        if conv_in_identity:                         # 1x1 stride-2 pad-0 conv == subsample
            id_rows = x[:, ::2, ::2, :].reshape(-1, IC)
            id_out = conv_bn_pallas(id_rows, w_to_mat_khwc(params["w_id"]),
                                    params["g_id"], params["b_id"],
                                    n_relu=0, out_dtype=jnp.bfloat16)[:, :OC]
        else:
            id_out = x.reshape(-1, IC)               # Sequential() passthrough (IC == OC)

    # --- stage 2: conv(ks, 1, pad=1) -> BN, fused (+ identity residual) (+ final ReLU) ----
    y1 = y1_rows.reshape(B, OH1, OW1, OC)            # only the OC real channels: K2 = ks*ks*OC
    p2, OH2, OW2 = im2col_nhwc(y1, ks, 1, 1)
    out_rows = conv_bn_pallas(p2, w_to_mat_khwc(params["w2"]), params["g2"], params["b2"],
                              residual=id_out, n_relu=OC, out_dtype=jnp.float32)
    out = out_rows[:, :OC].reshape(B, OH2, OW2, OC)
    return jnp.transpose(out, (0, 3, 1, 2))          # back to NCHW


# ---------------------------------------------------------------------------
# Plain-JAX reference (no Pallas) for verification.
# Conv inputs are rounded to bf16 like the Pallas MXU path, so the comparison checks kernel
# logic; remaining differences are bf16 intermediate (Y / residual) rounding + accumulation
# order, which the tolerance below covers.
# ---------------------------------------------------------------------------
def _q(x):
    return x.astype(jnp.bfloat16).astype(jnp.float32)


def _ref_conv(x, w, stride, pad):
    return jax.lax.conv_general_dilated(
        _q(x), _q(w), (stride, stride), [(pad, pad), (pad, pad)],
        dimension_numbers=("NCHW", "OIHW", "NCHW"),
        precision=jax.lax.Precision.HIGHEST)


def _ref_bn(y, g, b):
    mean = y.mean(axis=(0, 2, 3), keepdims=True)
    var = ((y - mean) ** 2).mean(axis=(0, 2, 3), keepdims=True)
    return (y - mean) * jax.lax.rsqrt(var + BN_EPS) * g.reshape(1, -1, 1, 1) + b.reshape(1, -1, 1, 1)


def ref_forward(x, params, stride, ks, conv_in_identity):
    y = _ref_conv(x, params["w1"], stride, 1)
    y = jax.nn.relu(_ref_bn(y, params["g1"][0], params["b1"][0]))
    y = _ref_conv(y, params["w2"], 1, 1)
    y = _ref_bn(y, params["g2"][0], params["b2"][0])
    if conv_in_identity:
        xi = _ref_conv(x, params["w_id"], 2, 0)
        xi = _ref_bn(xi, params["g_id"][0], params["b_id"][0])
    else:
        xi = x
    return jax.nn.relu(y + xi)


# ---------------------------------------------------------------------------
if __name__ == "__main__":
    in_channels, out_channels = 4, 8
    ks, stride, conv_in_identity = 3, 2, True
    dist_params = {"init_rho_post": -3.0, "init_mu_post": 0.05,
                   "sigma_prior": 0.1, "mu_prior": 0.0}

    key = jax.random.PRNGKey(0)
    kx, k1, k2, kid, kg = jax.random.split(key, 5)

    x = jax.random.normal(kx, (2, in_channels, 16, 16), jnp.float32)

    kg1, kg2, kg3, kb1, kb2, kb3 = jax.random.split(kg, 6)
    params = {
        "w1": sample_convbnn_weight(k1, out_channels, in_channels, ks, "normal", dist_params),
        "w2": sample_convbnn_weight(k2, out_channels, out_channels, ks, "fixed", dist_params),
        "w_id": sample_convbnn_weight(kid, out_channels, in_channels, 1, "normal", dist_params),
        "g1": (1.0 + 0.1 * jax.random.normal(kg1, (1, out_channels), jnp.float32)),
        "g2": (1.0 + 0.1 * jax.random.normal(kg2, (1, out_channels), jnp.float32)),
        "g_id": (1.0 + 0.1 * jax.random.normal(kg3, (1, out_channels), jnp.float32)),
        "b1": 0.1 * jax.random.normal(kb1, (1, out_channels), jnp.float32),
        "b2": 0.1 * jax.random.normal(kb2, (1, out_channels), jnp.float32),
        "b_id": 0.1 * jax.random.normal(kb3, (1, out_channels), jnp.float32),
    }

    fwd = jax.jit(functools.partial(resnet_bloc_forward, stride=stride, ks=ks,
                                    conv_in_identity=conv_in_identity))
    out = jax.block_until_ready(fwd(x, params))

    ref = ref_forward(x, params, stride, ks, conv_in_identity)
    assert out.shape == (2, out_channels, 8, 8)
    # bf16 MXU operands + bf16 (tile-mean-centred) Y / residual intermediates -> tolerance
    # covers bf16 rounding and accumulation-order differences of the two paths.
    np.testing.assert_allclose(np.asarray(out), np.asarray(ref), rtol=1e-2, atol=1e-2)

    print("KERNEL_OK")
</pallas_src>

<mosaic_0001>
module attributes {stable_mosaic.version = 11 : i64} {
  func.func @_matmul_stats_kernel(%arg0: i32, %arg1: memref<64x128xbf16, #tpu.memory_space<vmem>>, %arg2: memref<128x128xbf16, #tpu.memory_space<vmem>>, %arg3: memref<64x128xbf16, #tpu.memory_space<vmem>>, %arg4: memref<1x1x128xf32, #tpu.memory_space<vmem>>, %arg5: memref<1x1x128xf32, #tpu.memory_space<vmem>>) attributes {dimension_semantics = [#tpu.dimension_semantics<parallel>], iteration_bounds = array<i64: 2>, scalar_prefetch = 0 : i64, scratch_operands = 0 : i64, tpu.core_type = #tpu.core_type<tc>, window_params = [{transform_indices = @transform_0, window_bounds = array<i64: 64, 128>}, {pipeline_mode = #tpu.pipeline_mode<synchronous>, transform_indices = @transform_1, window_bounds = array<i64: 128, 128>}, {transform_indices = @transform_2, window_bounds = array<i64: 64, 128>}, {transform_indices = @transform_3, window_bounds = array<i64: 1, 1, 128>}, {transform_indices = @transform_4, window_bounds = array<i64: 1, 1, 128>}]} {
    %c0 = arith.constant 0 : index
    %c0_0 = arith.constant 0 : index
    %0 = vector.load %arg1[%c0, %c0_0] : memref<64x128xbf16, #tpu.memory_space<vmem>>, vector<64x128xbf16>
    %c0_1 = arith.constant 0 : index
    %c0_2 = arith.constant 0 : index
    %1 = vector.load %arg2[%c0_1, %c0_2] : memref<128x128xbf16, #tpu.memory_space<vmem>>, vector<128x128xbf16>
    %cst = arith.constant dense<0.000000e+00> : vector<64x128xf32>
    %2 = tpu.matmul %0, %1, %cst {dimension_numbers = #tpu.dot_dimension_numbers<[1], [0], [0], [1], [0, 0, 1, 1], [], []>} : vector<64x128xbf16>, vector<128x128xbf16>, vector<64x128xf32> -> vector<64x128xf32>
    %cst_3 = arith.constant dense<0.000000e+00> : vector<128xf32>
    %3 = vector.multi_reduction <add>, %2, %cst_3 [0] : vector<64x128xf32> to vector<128xf32>
    %4 = vector.shape_cast %3 : vector<128xf32> to vector<1x128xf32>
    %5 = vector.shape_cast %4 : vector<1x128xf32> to vector<1x1x128xf32>
    %c0_4 = arith.constant 0 : index
    %c0_5 = arith.constant 0 : index
    %c0_6 = arith.constant 0 : index
    %6 = vector.load %arg4[%c0_4, %c0_5, %c0_6] : memref<1x1x128xf32, #tpu.memory_space<vmem>>, vector<1x1x128xf32>
    tpu.vector_store %arg4[%c0_4, %c0_5, %c0_6], %5 {strides = array<i32>} : memref<1x1x128xf32, #tpu.memory_space<vmem>>, vector<1x1x128xf32>,
    %7 = arith.mulf %2, %2 : vector<64x128xf32>
    %cst_7 = arith.constant dense<0.000000e+00> : vector<128xf32>
    %8 = vector.multi_reduction <add>, %7, %cst_7 [0] : vector<64x128xf32> to vector<128xf32>
    %9 = vector.shape_cast %8 : vector<128xf32> to vector<1x128xf32>
    %10 = vector.shape_cast %9 : vector<1x128xf32> to vector<1x1x128xf32>
    %c0_8 = arith.constant 0 : index
    %c0_9 = arith.constant 0 : index
    %c0_10 = arith.constant 0 : index
    %11 = vector.load %arg5[%c0_8, %c0_9, %c0_10] : memref<1x1x128xf32, #tpu.memory_space<vmem>>, vector<1x1x128xf32>
    tpu.vector_store %arg5[%c0_8, %c0_9, %c0_10], %10 {strides = array<i32>} : memref<1x1x128xf32, #tpu.memory_space<vmem>>, vector<1x1x128xf32>,
    %cst_11 = arith.constant 1.562500e-02 : f32
    %12 = vector.broadcast %cst_11 : f32 to vector<1x128xf32>
    %13 = arith.mulf %4, %12 : vector<1x128xf32>
    %14 = vector.broadcast %13 : vector<1x128xf32> to vector<64x128xf32>
    %15 = arith.subf %2, %14 : vector<64x128xf32>
    %16 = arith.truncf %15 : vector<64x128xf32> to vector<64x128xbf16>
    %c0_12 = arith.constant 0 : index
    %c0_13 = arith.constant 0 : index
    %17 = vector.load %arg3[%c0_12, %c0_13] : memref<64x128xbf16, #tpu.memory_space<vmem>>, vector<64x128xbf16>
    tpu.vector_store %arg3[%c0_12, %c0_13], %16 {strides = array<i32>} : memref<64x128xbf16, #tpu.memory_space<vmem>>, vector<64x128xbf16>,
    return
  }
  func.func @transform_0(%arg0: i32) -> (i32, i32) {
    %c0_i32 = arith.constant 0 : i32
    %c0_i32_0 = arith.constant 0 : i32
    return %arg0, %c0_i32 : i32, i32
  }
  func.func @transform_1(%arg0: i32) -> (i32, i32) {
    %c0_i32 = arith.constant 0 : i32
    %c0_i32_0 = arith.constant 0 : i32
    %c0_i32_1 = arith.constant 0 : i32
    return %c0_i32, %c0_i32_0 : i32, i32
  }
  func.func @transform_2(%arg0: i32) -> (i32, i32) {
    %c0_i32 = arith.constant 0 : i32
    %c0_i32_0 = arith.constant 0 : i32
    return %arg0, %c0_i32 : i32, i32
  }
  func.func @transform_3(%arg0: i32) -> (i32, i32, i32) {
    %c0_i32 = arith.constant 0 : i32
    %c0_i32_0 = arith.constant 0 : i32
    %c0_i32_1 = arith.constant 0 : i32
    return %arg0, %c0_i32, %c0_i32_0 : i32, i32, i32
  }
  func.func @transform_4(%arg0: i32) -> (i32, i32, i32) {
    %c0_i32 = arith.constant 0 : i32
    %c0_i32_0 = arith.constant 0 : i32
    %c0_i32_1 = arith.constant 0 : i32
    return %arg0, %c0_i32, %c0_i32_0 : i32, i32, i32
  }
}

module attributes {stable_mosaic.version = 11 : i64} {
  func.func @kernel(%arg0: i32, %arg1: memref<64x128xbf16, #tpu.memory_space<vmem>>, %arg2: memref<1x1x128xf32, #tpu.memory_space<vmem>>, %arg3: memref<1x128xf32, #tpu.memory_space<vmem>>, %arg4: memref<1x128xf32, #tpu.memory_space<vmem>>, %arg5: memref<1x128xf32, #tpu.memory_space<vmem>>, %arg6: memref<64x128xbf16, #tpu.memory_space<vmem>>) attributes {dimension_semantics = [#tpu.dimension_semantics<parallel>], iteration_bounds = array<i64: 2>, scalar_prefetch = 0 : i64, scratch_operands = 0 : i64, tpu.core_type = #tpu.core_type<tc>, window_params = [{transform_indices = @transform_0, window_bounds = array<i64: 64, 128>}, {transform_indices = @transform_1, window_bounds = array<i64: 1, 1, 128>}, {pipeline_mode = #tpu.pipeline_mode<synchronous>, transform_indices = @transform_2, window_bounds = array<i64: 1, 128>}, {pipeline_mode = #tpu.pipeline_mode<synchronous>, transform_indices = @transform_3, window_bounds = array<i64: 1, 128>}, {pipeline_mode = #tpu.pipeline_mode<synchronous>, transform_indices = @transform_4, window_bounds = array<i64: 1, 128>}, {transform_indices = @transform_5, window_bounds = array<i64: 64, 128>}]} {
    %c0 = arith.constant 0 : index
    %c0_0 = arith.constant 0 : index
    %0 = vector.load %arg1[%c0, %c0_0] : memref<64x128xbf16, #tpu.memory_space<vmem>>, vector<64x128xbf16>
    %1 = arith.extf %0 : vector<64x128xbf16> to vector<64x128xf32>
    %c0_1 = arith.constant 0 : index
    %c0_2 = arith.constant 0 : index
    %c0_3 = arith.constant 0 : index
    %2 = vector.load %arg2[%c0_1, %c0_2, %c0_3] : memref<1x1x128xf32, #tpu.memory_space<vmem>>, vector<1x1x128xf32>
    %3 = vector.shape_cast %2 : vector<1x1x128xf32> to vector<1x128xf32>
    %4 = vector.broadcast %3 : vector<1x128xf32> to vector<64x128xf32>
    %5 = arith.addf %1, %4 : vector<64x128xf32>
    %c0_4 = arith.constant 0 : index
    %c0_5 = arith.constant 0 : index
    %6 = vector.load %arg3[%c0_4, %c0_5] : memref<1x128xf32, #tpu.memory_space<vmem>>, vector<1x128xf32>
    %7 = vector.broadcast %6 : vector<1x128xf32> to vector<64x128xf32>
    %8 = arith.mulf %5, %7 : vector<64x128xf32>
    %c0_6 = arith.constant 0 : index
    %c0_7 = arith.constant 0 : index
    %9 = vector.load %arg4[%c0_6, %c0_7] : memref<1x128xf32, #tpu.memory_space<vmem>>, vector<1x128xf32>
    %10 = vector.broadcast %9 : vector<1x128xf32> to vector<64x128xf32>
    %11 = arith.addf %8, %10 : vector<64x128xf32>
    %c0_8 = arith.constant 0 : index
    %c0_9 = arith.constant 0 : index
    %12 = vector.load %arg5[%c0_8, %c0_9] : memref<1x128xf32, #tpu.memory_space<vmem>>, vector<1x128xf32>
    %13 = vector.broadcast %12 : vector<1x128xf32> to vector<64x128xf32>
    %14 = arith.maximumf %11, %13 : vector<64x128xf32>
    %15 = arith.truncf %14 : vector<64x128xf32> to vector<64x128xbf16>
    %c0_10 = arith.constant 0 : index
    %c0_11 = arith.constant 0 : index
    %16 = vector.load %arg6[%c0_10, %c0_11] : memref<64x128xbf16, #tpu.memory_space<vmem>>, vector<64x128xbf16>
    tpu.vector_store %arg6[%c0_10, %c0_11], %15 {strides = array<i32>} : memref<64x128xbf16, #tpu.memory_space<vmem>>, vector<64x128xbf16>,
    return
  }
  func.func @transform_0(%arg0: i32) -> (i32, i32) {
    %c0_i32 = arith.constant 0 : i32
    %c0_i32_0 = arith.constant 0 : i32
    return %arg0, %c0_i32 : i32, i32
  }
  func.func @transform_1(%arg0: i32) -> (i32, i32, i32) {
    %c0_i32 = arith.constant 0 : i32
    %c0_i32_0 = arith.constant 0 : i32
    %c0_i32_1 = arith.constant 0 : i32
    return %arg0, %c0_i32, %c0_i32_0 : i32, i32, i32
  }
  func.func @transform_2(%arg0: i32) -> (i32, i32) {
    %c0_i32 = arith.constant 0 : i32
    %c0_i32_0 = arith.constant 0 : i32
    %c0_i32_1 = arith.constant 0 : i32
    return %c0_i32, %c0_i32_0 : i32, i32
  }
  func.func @transform_3(%arg0: i32) -> (i32, i32) {
    %c0_i32 = arith.constant 0 : i32
    %c0_i32_0 = arith.constant 0 : i32
    %c0_i32_1 = arith.constant 0 : i32
    return %c0_i32, %c0_i32_0 : i32, i32
  }
  func.func @transform_4(%arg0: i32) -> (i32, i32) {
    %c0_i32 = arith.constant 0 : i32
    %c0_i32_0 = arith.constant 0 : i32
    %c0_i32_1 = arith.constant 0 : i32
    return %c0_i32, %c0_i32_0 : i32, i32
  }
  func.func @transform_5(%arg0: i32) -> (i32, i32) {
    %c0_i32 = arith.constant 0 : i32
    %c0_i32_0 = arith.constant 0 : i32
    return %arg0, %c0_i32 : i32, i32
  }
}

module attributes {stable_mosaic.version = 11 : i64} {
  func.func @kernel(%arg0: i32, %arg1: memref<64x128xbf16, #tpu.memory_space<vmem>>, %arg2: memref<1x1x128xf32, #tpu.memory_space<vmem>>, %arg3: memref<1x128xf32, #tpu.memory_space<vmem>>, %arg4: memref<1x128xf32, #tpu.memory_space<vmem>>, %arg5: memref<1x128xf32, #tpu.memory_space<vmem>>, %arg6: memref<64x128xbf16, #tpu.memory_space<vmem>>, %arg7: memref<64x128xf32, #tpu.memory_space<vmem>>) attributes {dimension_semantics = [#tpu.dimension_semantics<parallel>], iteration_bounds = array<i64: 2>, scalar_prefetch = 0 : i64, scratch_operands = 0 : i64, tpu.core_type = #tpu.core_type<tc>, window_params = [{transform_indices = @transform_0, window_bounds = array<i64: 64, 128>}, {transform_indices = @transform_1, window_bounds = array<i64: 1, 1, 128>}, {pipeline_mode = #tpu.pipeline_mode<synchronous>, transform_indices = @transform_2, window_bounds = array<i64: 1, 128>}, {pipeline_mode = #tpu.pipeline_mode<synchronous>, transform_indices = @transform_3, window_bounds = array<i64: 1, 128>}, {pipeline_mode = #tpu.pipeline_mode<synchronous>, transform_indices = @transform_4, window_bounds = array<i64: 1, 128>}, {transform_indices = @transform_5, window_bounds = array<i64: 64, 128>}, {transform_indices = @transform_6, window_bounds = array<i64: 64, 128>}]} {
    %c0 = arith.constant 0 : index
    %c0_0 = arith.constant 0 : index
    %0 = vector.load %arg1[%c0, %c0_0] : memref<64x128xbf16, #tpu.memory_space<vmem>>, vector<64x128xbf16>
    %1 = arith.extf %0 : vector<64x128xbf16> to vector<64x128xf32>
    %c0_1 = arith.constant 0 : index
    %c0_2 = arith.constant 0 : index
    %c0_3 = arith.constant 0 : index
    %2 = vector.load %arg2[%c0_1, %c0_2, %c0_3] : memref<1x1x128xf32, #tpu.memory_space<vmem>>, vector<1x1x128xf32>
    %3 = vector.shape_cast %2 : vector<1x1x128xf32> to vector<1x128xf32>
    %4 = vector.broadcast %3 : vector<1x128xf32> to vector<64x128xf32>
    %5 = arith.addf %1, %4 : vector<64x128xf32>
    %c0_4 = arith.constant 0 : index
    %c0_5 = arith.constant 0 : index
    %6 = vector.load %arg3[%c0_4, %c0_5] : memref<1x128xf32, #tpu.memory_space<vmem>>, vector<1x128xf32>
    %7 = vector.broadcast %6 : vector<1x128xf32> to vector<64x128xf32>
    %8 = arith.mulf %5, %7 : vector<64x128xf32>
    %c0_6 = arith.constant 0 : index
    %c0_7 = arith.constant 0 : index
    %9 = vector.load %arg4[%c0_6, %c0_7] : memref<1x128xf32, #tpu.memory_space<vmem>>, vector<1x128xf32>
    %10 = vector.broadcast %9 : vector<1x128xf32> to vector<64x128xf32>
    %11 = arith.addf %8, %10 : vector<64x128xf32>
    %c0_8 = arith.constant 0 : index
    %c0_9 = arith.constant 0 : index
    %12 = vector.load %arg6[%c0_8, %c0_9] : memref<64x128xbf16, #tpu.memory_space<vmem>>, vector<64x128xbf16>
    %13 = arith.extf %12 : vector<64x128xbf16> to vector<64x128xf32>
    %14 = arith.addf %11, %13 : vector<64x128xf32>
    %c0_10 = arith.constant 0 : index
    %c0_11 = arith.constant 0 : index
    %15 = vector.load %arg5[%c0_10, %c0_11] : memref<1x128xf32, #tpu.memory_space<vmem>>, vector<1x128xf32>
    %16 = vector.broadcast %15 : vector<1x128xf32> to vector<64x128xf32>
    %17 = arith.maximumf %14, %16 : vector<64x128xf32>
    %c0_12 = arith.constant 0 : index
    %c0_13 = arith.constant 0 : index
    %18 = vector.load %arg7[%c0_12, %c0_13] : memref<64x128xf32, #tpu.memory_space<vmem>>, vector<64x128xf32>
    tpu.vector_store %arg7[%c0_12, %c0_13], %17 {strides = array<i32>} : memref<64x128xf32, #tpu.memory_space<vmem>>, vector<64x128xf32>,
    return
  }
  func.func @transform_0(%arg0: i32) -> (i32, i32) {
    %c0_i32 = arith.constant 0 : i32
    %c0_i32_0 = arith.constant 0 : i32
    return %arg0, %c0_i32 : i32, i32
  }
  func.func @transform_1(%arg0: i32) -> (i32, i32, i32) {
    %c0_i32 = arith.constant 0 : i32
    %c0_i32_0 = arith.constant 0 : i32
    %c0_i32_1 = arith.constant 0 : i32
    return %arg0, %c0_i32, %c0_i32_0 : i32, i32, i32
  }
  func.func @transform_2(%arg0: i32) -> (i32, i32) {
    %c0_i32 = arith.constant 0 : i32
    %c0_i32_0 = arith.constant 0 : i32
    %c0_i32_1 = arith.constant 0 : i32
    return %c0_i32, %c0_i32_0 : i32, i32
  }
  func.func @transform_3(%arg0: i32) -> (i32, i32) {
    %c0_i32 = arith.constant 0 : i32
    %c0_i32_0 = arith.constant 0 : i32
    %c0_i32_1 = arith.constant 0 : i32
    return %c0_i32, %c0_i32_0 : i32, i32
  }
  func.func @transform_4(%arg0: i32) -> (i32, i32) {
    %c0_i32 = arith.constant 0 : i32
    %c0_i32_0 = arith.constant 0 : i32
    %c0_i32_1 = arith.constant 0 : i32
    return %c0_i32, %c0_i32_0 : i32, i32
  }
  func.func @transform_5(%arg0: i32) -> (i32, i32) {
    %c0_i32 = arith.constant 0 : i32
    %c0_i32_0 = arith.constant 0 : i32
    return %arg0, %c0_i32 : i32, i32
  }
  func.func @transform_6(%arg0: i32) -> (i32, i32) {
    %c0_i32 = arith.constant 0 : i32
    %c0_i32_0 = arith.constant 0 : i32
    return %arg0, %c0_i32 : i32, i32
  }
}

</mosaic_0001>

<bundles_post_ra>
// kernel: resnet_bloc_forward.5
= control target key start
LH: loop header
LB: loop body
LE: loop exit
PB: predicated region body
PF: predicated region fallthrough
CT: control target
= control target key end

     0   :  { %s490_s18 = smov 0   ;;  %s526_s0 = inlined_call_operand.vmem [shape: bf16[128,128], index: 0, kind: input, shape index: {}]   ;;  %s527_s1 = inlined_call_operand.vmem [shape: f32[2,1,128], index: 1, kind: input, shape index: {}]   ;;  %s528_s2 = inlined_call_operand.vmem [shape: f32[1,128], index: 2, kind: input, shape index: {}]   ;;  %s529_s3 = inlined_call_operand.vmem [shape: f32[1,128], index: 3, kind: input, shape index: {}]   ;;  %s530_s4 = inlined_call_operand.vmem [shape: f32[1,128], index: 4, kind: input, shape index: {}]   ;;  %s531_s5 = inlined_call_operand.vmem [shape: bf16[128,128], index: 5, kind: output, shape index: {}]  }
   0x1 LB: > { %s387_s19 = sadd.s32 4294967295, %s458_s18   ;;  %p391_p0 = scmp.ge.s32.totalorder %s458_s18, 1  ;;  %s458_s18 = sphi %s490_s18, %s15_s18  }
   0x2   : > { %p196_p1 = scmp.lt.s32.totalorder %s458_s18, 3 }
   0x4   : > { %p197_p2 = pnand %p391_p0, %p196_p1 }
   0x5   : > { %s392_s20 = sshll.u32 (!%p197_p2), %s387_s19, 3  ;;  %p233_p3 = scmp.lt.s32.totalorder (!%p197_p2), %s387_s19, 1 }
   0x6   : > { %200 = sbr.rel (%p197_p2) target bundleno = 31 (0x1f), region = 40  ;;  %p228_p4 = scmp.lt.s32.totalorder (!%p197_p2), %s392_s20, 15 }
   0xb   : > { %s533_s19 = smov (!%p233_p3, %s387_s19), 1  ;;  %s535_s20 = smov (!%p228_p4, %s392_s20), 15  ;;  %v449_v9 = vld [vmem:[%s528_s2] ss:$0 sm:$0xff] }
   0xc   : > { %s235_s23 = scalar_lea.vmem %s527_s1, %s533_s19  ;;  %s393_s24 = sshll.u32 %s535_s20, 2  ;;  %v450_v16 = vld [vmem:[%s529_s3] ss:$0 sm:$0xff] }
   0xd   : > { %s231_s27 = scalar_lea.vmem %s526_s0, %s393_s24  ;;  %v448_v0 = vld [vmem:[%s235_s23] ss:$0 sm:$0xff]  ;;  %s240_s11 = scalar_lea.vmem %s531_s5, %s393_s24 }
   0xe   : > { %v399_v1 = vld [vmem:[%s231_s27] sm:$0xff]   ;;  %v434_v2 = vld [vmem:[%s231_s27 + $0x8] sm:$0xff]   ;;  %v435_v3 = vld [vmem:[%s231_s27 + $0x10] sm:$0xff]  }
   0xf   : > { %v400_v4 = vunpack.c.l.bf16 %v399_v1  ;;  %v401_v5 = vunpack.c.h.bf16 %v399_v1  ;;  %v404_v6 = vunpack.c.l.bf16 %v434_v2  ;;  %v405_v7 = vunpack.c.h.bf16 %v434_v2  ;;  %v436_v8 = vld [vmem:[%s231_s27 + $0x18] sm:$0xff]   ;;  %v451_v25 = vld [vmem:[%s530_s4] ss:$0 sm:$0xff] }
  0x10   : > { %v408_v10 = vunpack.c.l.bf16 %v435_v3  ;;  %v409_v11 = vunpack.c.h.bf16 %v435_v3  ;;  %v412_v12 = vunpack.c.l.bf16 %v436_v8  ;;  %v413_v13 = vunpack.c.h.bf16 %v436_v8 }
  0x11   : > { %v262_v14 = vadd.f32 %v448_v0, %v400_v4  ;;  %v263_v15 = vadd.f32 %v448_v0, %v401_v5  ;;  %v264_v17 = vadd.f32 %v448_v0, %v404_v6  ;;  %v265_v18 = vadd.f32 %v448_v0, %v405_v7 }
  0x12   : > { %v266_v19 = vadd.f32 %v448_v0, %v408_v10  ;;  %v267_v20 = vadd.f32 %v448_v0, %v409_v11  ;;  %v268_v21 = vadd.f32 %v448_v0, %v412_v12  ;;  %v269_v22 = vadd.f32 %v448_v0, %v413_v13 }
  0x13   : > { %v274_v23 = vmul.f32 %v449_v9, %v262_v14  ;;  %v275_v24 = vmul.f32 %v449_v9, %v263_v15  ;;  %v276_v26 = vmul.f32 %v449_v9, %v264_v17  ;;  %v277_v27 = vmul.f32 %v449_v9, %v265_v18 }
  0x14   : > { %v278_v28 = vmul.f32 %v449_v9, %v266_v19  ;;  %v279_v29 = vmul.f32 %v449_v9, %v267_v20  ;;  %v280_v30 = vmul.f32 %v449_v9, %v268_v21  ;;  %v281_v31 = vmul.f32 %v449_v9, %v269_v22 }
  0x15   : > { %v286_v32 = vadd.f32 %v450_v16, %v274_v23  ;;  %v287_v33 = vadd.f32 %v450_v16, %v275_v24  ;;  %v288_v34 = vadd.f32 %v450_v16, %v276_v26  ;;  %v289_v35 = vadd.f32 %v450_v16, %v277_v27 }
  0x16   : > { %v290_v36 = vadd.f32 %v450_v16, %v278_v28  ;;  %v291_v37 = vadd.f32 %v450_v16, %v279_v29  ;;  %v292_v38 = vadd.f32 %v450_v16, %v280_v30  ;;  %v293_v39 = vadd.f32 %v450_v16, %v281_v31 }
  0x17   : > { %v298_v40 = vmax.f32 %v286_v32, %v451_v25  ;;  %v299_v41 = vmax.f32 %v287_v33, %v451_v25  ;;  %v300_v42 = vmax.f32 %v288_v34, %v451_v25  ;;  %v301_v43 = vmax.f32 %v289_v35, %v451_v25 }
  0x18   : > { %v302_v44 = vmax.f32 %v290_v36, %v451_v25  ;;  %v303_v45 = vmax.f32 %v291_v37, %v451_v25  ;;  %v304_v46 = vmax.f32 %v292_v38, %v451_v25  ;;  %v305_v47 = vmax.f32 %v293_v39, %v451_v25 }
  0x19   : > { %v417_v48 = vpack.c.bf16 %v299_v41, %v298_v40  ;;  %v422_v49 = vpack.c.bf16 %v301_v43, %v300_v42 }
  0x1a   : > { %v427_v50 = vpack.c.bf16 %v303_v45, %v302_v44  ;;  %v432_v51 = vpack.c.bf16 %v305_v47, %v304_v46 }
  0x1b   : > { %418 = vst [vmem:[%s240_s11] sm:$0xff] %v417_v48  }
  0x1c   : > { %437 = vst [vmem:[%s240_s11 + $0x8] sm:$0xff] %v422_v49  }
  0x1d   : > { %438 = vst [vmem:[%s240_s11 + $0x10] sm:$0xff] %v427_v50  }
  0x1e   : > { %439 = vst [vmem:[%s240_s11 + $0x18] sm:$0xff] %v432_v51  }
  0x1f PF: > { %s15_s18 = sadd.s32 1, %s458_s18  }
  0x20   : > { %p12_p5 = scmp.ge.s32.totalorder %s15_s18, 4  }
  0x22   :  { %14 = sbr.rel (!%p12_p5) target bundleno = 1 (0x1), region = 73 }

// kernel: resnet_bloc_forward.4
= control target key start
LH: loop header
LB: loop body
LE: loop exit
PB: predicated region body
PF: predicated region fallthrough
CT: control target
= control target key end

     0   :  { %s669_s15 = smov 0   ;;  %s728_s0 = inlined_call_operand.vmem [shape: bf16[128,128], index: 0, kind: input, shape index: {}]   ;;  %s729_s1 = inlined_call_operand.vmem [shape: bf16[128,128], index: 1, kind: input, shape index: {}]   ;;  %s730_s2 = inlined_call_operand.vmem [shape: bf16[128,128], index: 2, kind: output, shape index: {0}]   ;;  %s731_s3 = inlined_call_operand.vmem [shape: f32[2,1,128], index: 3, kind: output, shape index: {1}]   ;;  %s732_s4 = inlined_call_operand.vmem [shape: f32[2,1,128], index: 4, kind: output, shape index: {2}]  }
   0x1 LB: > { %s675_s16 = sadd.s32 4294967295, %s642_s15   ;;  %p514_p0 = scmp.ge.s32.totalorder %s642_s15, 1  ;;  %s642_s15 = sphi %s669_s15, %s15_s15  }
   0x2   : > { %p168_p1 = scmp.lt.s32.totalorder %s642_s15, 3 }
   0x4   : > { %p169_p2 = pnand %p514_p0, %p168_p1 }
   0x5   : > { %s515_s25 = sshll.u32 (!%p169_p2), %s675_s16, 3  ;;  %p212_p4 = scmp.lt.s32.totalorder (!%p169_p2), %s675_s16, 1 }
   0x6   : > { %172 = sbr.rel (%p169_p2) target bundleno = 213 (0xd5), region = 28  ;;  %p201_p3 = scmp.lt.s32.totalorder (!%p169_p2), %s515_s25, 15 }
   0xb   : > { %v580_v0 = vld [vmem:[%s729_s1 + $0x38] sm:$0xff]  ;;  %v579_v1 = vld [vmem:[%s729_s1 + $0x30] sm:$0xff]  ;;  %v578_v2 = vld [vmem:[%s729_s1 + $0x28] sm:$0xff]  ;;  %s734_s25 = smov (!%p201_p3, %s515_s25), 15  ;;  %s736_s16 = smov (!%p212_p4, %s675_s16), 1 }
   0xc   : > { %314 = vmatpush.bf16.msra.mxu0 %v580_v0  ;;  %604 = vmatpush.bf16.msra.mxu1 %v580_v0  ;;  %v577_v3 = vld [vmem:[%s729_s1 + $0x20] sm:$0xff]  ;;  %v576_v4 = vld [vmem:[%s729_s1 + $0x18] sm:$0xff]  ;;  %v575_v5 = vld [vmem:[%s729_s1 + $0x10] sm:$0xff]  ;;  %s516_s6 = sshll.u32 %s734_s25, 2  ;;  %s214_s14 = scalar_lea.vmem %s731_s3, %s736_s16 }
   0xd   : > { %605 = vmatpush.bf16.msra.mxu2 %v580_v0  ;;  %606 = vmatpush.bf16.msra.mxu3 %v580_v0  ;;  %v574_v6 = vld [vmem:[%s729_s1 + $0x8] sm:$0xff]  ;;  %v573_v7 = vld [vmem:[%s729_s1] sm:$0xff]  ;;  %s204_s11 = scalar_lea.vmem %s728_s0, %s516_s6  ;;  %s217_s19 = scalar_lea.vmem %s732_s4, %s736_s16 }
   0xe   : > { %v569_v8 = vld [vmem:[%s204_s11] sm:$0xff]  ;;  %v570_v9 = vld [vmem:[%s204_s11 + $0x8] sm:$0xff]  ;;  %v571_v10 = vld [vmem:[%s204_s11 + $0x10] sm:$0xff]  ;;  %s210_s22 = scalar_lea.vmem %s730_s2, %s516_s6 }
   0xf   : > { %v572_v11 = vld [vmem:[%s204_s11 + $0x18] sm:$0xff] }
  0x10   : > { %315 = vmatpush.bf16.msra.mxu0 %v579_v1  ;;  %607 = vmatpush.bf16.msra.mxu1 %v579_v1 }
  0x11   : > { %608 = vmatpush.bf16.msra.mxu2 %v579_v1  ;;  %609 = vmatpush.bf16.msra.mxu3 %v579_v1 }
  0x14   : > { %316 = vmatpush.bf16.msra.mxu0 %v578_v2  ;;  %610 = vmatpush.bf16.msra.mxu1 %v578_v2 }
  0x15   : > { %611 = vmatpush.bf16.msra.mxu2 %v578_v2  ;;  %612 = vmatpush.bf16.msra.mxu3 %v578_v2 }
  0x18   : > { %317 = vmatpush.bf16.msra.mxu0 %v577_v3  ;;  %613 = vmatpush.bf16.msra.mxu1 %v577_v3 }
  0x19   : > { %614 = vmatpush.bf16.msra.mxu2 %v577_v3  ;;  %615 = vmatpush.bf16.msra.mxu3 %v577_v3 }
  0x1c   : > { %318 = vmatpush.bf16.msra.mxu0 %v576_v4  ;;  %616 = vmatpush.bf16.msra.mxu1 %v576_v4 }
  0x1d   : > { %617 = vmatpush.bf16.msra.mxu2 %v576_v4  ;;  %618 = vmatpush.bf16.msra.mxu3 %v576_v4 }
  0x20   : > { %319 = vmatpush.bf16.msra.mxu0 %v575_v5  ;;  %619 = vmatpush.bf16.msra.mxu1 %v575_v5 }
  0x21   : > { %620 = vmatpush.bf16.msra.mxu2 %v575_v5  ;;  %621 = vmatpush.bf16.msra.mxu3 %v575_v5 }
  0x24   : > { %320 = vmatpush.bf16.msra.mxu0 %v574_v6  ;;  %622 = vmatpush.bf16.msra.mxu1 %v574_v6 }
  0x25   : > { %623 = vmatpush.bf16.msra.mxu2 %v574_v6  ;;  %624 = vmatpush.bf16.msra.mxu3 %v574_v6 }
  0x28   : > { %321 = vmatpush.bf16.msra.mxu0 %v573_v7  ;;  %625 = vmatpush.bf16.msra.mxu1 %v573_v7 }
  0x29   : > { %626 = vmatpush.bf16.msra.mxu2 %v573_v7  ;;  %627 = vmatpush.bf16.msra.mxu3 %v573_v7 }
  0x2b   : > { %322 = vmatmul.bf16.vlgmr.msra.gmra.mxu0 %v569_v8  ;;  %327 = vmatmul.bf16.vlgmr.msra.gmra.mxu1 %v570_v9 }
  0x2c   : > { %332 = vmatmul.bf16.vlgmr.msra.gmra.mxu2 %v571_v10  ;;  %337 = vmatmul.bf16.vlgmr.msra.gmra.mxu3 %v572_v11 }
  0xa8   : > { %v323_v12 = vpop.f32.mrf.mxu0  ;;  %v328_v13 = vpop.f32.mrf.mxu1 }
  0xa9   : > { %v357_v17 = vmul.f32 %v323_v12, %v323_v12  ;;  %v359_v21 = vmul.f32 %v328_v13, %v328_v13 }
  0xaf   : > { %v333_v14 = vpop.f32.mrf.mxu2  ;;  %v338_v15 = vpop.f32.mrf.mxu3 }
  0xb0   : > { %v325_v16 = vpop.f32.mrf.mxu0  ;;  %v330_v20 = vpop.f32.mrf.mxu1  ;;  %v361_v27 = vmul.f32 %v333_v14, %v333_v14  ;;  %v363_v35 = vmul.f32 %v338_v15, %v338_v15 }
  0xb1   : > { %v343_v18 = vadd.f32 %v325_v16, %v323_v12  ;;  %v358_v19 = vmul.f32 %v325_v16, %v325_v16  ;;  %v360_v25 = vmul.f32 %v330_v20, %v330_v20 }
  0xb3   : > { %v365_v22 = vadd.f32 %v358_v19, %v357_v17  ;;  %v344_v23 = vadd.f32 %v343_v18, %v328_v13 }
  0xb5   : > { %v345_v24 = vadd.f32 %v344_v23, %v330_v20  ;;  %v366_v26 = vadd.f32 %v365_v22, %v359_v21 }
  0xb7   : > { %v367_v28 = vadd.f32 %v366_v26, %v360_v25  ;;  %v335_v29 = vpop.f32.mrf.mxu2  ;;  %v346_v30 = vadd.f32 %v345_v24, %v333_v14  ;;  %v340_v34 = vpop.f32.mrf.mxu3 }
  0xb8   : > { %v362_v32 = vmul.f32 %v335_v29, %v335_v29  ;;  %v364_v39 = vmul.f32 %v340_v34, %v340_v34 }
  0xb9   : > { %v347_v31 = vadd.f32 %v346_v30, %v335_v29  ;;  %v368_v33 = vadd.f32 %v367_v28, %v361_v27 }
  0xbb   : > { %v369_v36 = vadd.f32 %v368_v33, %v362_v32  ;;  %v348_v37 = vadd.f32 %v347_v31, %v338_v15 }
  0xbd   : > { %v349_v38 = vadd.f32 %v348_v37, %v340_v34  ;;  %v370_v40 = vadd.f32 %v369_v36, %v363_v35 }
  0xbf   : > { %v350_v41 = vrot.slane %v349_v38, 4  ;;  %v371_v42 = vadd.f32 %v370_v40, %v364_v39 }
  0xc1   : > { %v351_v43 = vadd.f32 %v350_v41, %v349_v38  ;;  %v372_v44 = vrot.slane %v371_v42, 4 }
  0xc3   : > { %v352_v45 = vrot.slane %v351_v43, 2  ;;  %v373_v46 = vadd.f32 %v372_v44, %v371_v42 }
  0xc5   : > { %v353_v47 = vadd.f32 %v352_v45, %v351_v43  ;;  %v374_v48 = vrot.slane %v373_v46, 2 }
  0xc7   : > { %v354_v49 = vrot.slane %v353_v47, 1  ;;  %v375_v50 = vadd.f32 %v374_v48, %v373_v46 }
  0xc9   : > { %v355_v51 = vadd.f32 %v354_v49, %v353_v47  ;;  %v376_v52 = vrot.slane %v375_v50, 1 }
  0xcb   : > { %356 = vst [vmem:[%s214_s14] sm:$0x1] %v355_v51  ;;  %v377_v53 = vadd.f32 %v376_v52, %v375_v50  ;;  %v379_v54 = vmul.f32 0.015625, %v355_v51 }
  0xcd   : > { %378 = vst [vmem:[%s217_s19] sm:$0x1] %v377_v53  ;;  %v380_v55 = vsub.f32 %v323_v12, %v379_v54  ;;  %v381_v56 = vsub.f32 %v325_v16, %v379_v54  ;;  %v382_v57 = vsub.f32 %v328_v13, %v379_v54  ;;  %v383_v58 = vsub.f32 %v330_v20, %v379_v54 }
  0xce   : > { %v384_v59 = vsub.f32 %v333_v14, %v379_v54  ;;  %v385_v60 = vsub.f32 %v335_v29, %v379_v54  ;;  %v386_v61 = vsub.f32 %v338_v15, %v379_v54  ;;  %v387_v62 = vsub.f32 %v340_v34, %v379_v54 }
  0xcf   : > { %v584_v63 = vpack.c.bf16 %v381_v56, %v380_v55  ;;  %v589_v0 = vpack.c.bf16 %v383_v58, %v382_v57 }
  0xd0   : > { %v594_v1 = vpack.c.bf16 %v385_v60, %v384_v59  ;;  %v599_v2 = vpack.c.bf16 %v387_v62, %v386_v61 }
  0xd1   : > { %585 = vst [vmem:[%s210_s22] sm:$0xff] %v584_v63  }
  0xd2   : > { %601 = vst [vmem:[%s210_s22 + $0x8] sm:$0xff] %v589_v0  }
  0xd3   : > { %602 = vst [vmem:[%s210_s22 + $0x10] sm:$0xff] %v594_v1  }
  0xd4   : > { %603 = vst [vmem:[%s210_s22 + $0x18] sm:$0xff] %v599_v2  }
  0xd5 PF: > { %s15_s15 = sadd.s32 1, %s642_s15  }
  0xd6   : > { %p12_p5 = scmp.ge.s32.totalorder %s15_s15, 4  }
  0xd8   :  { %14 = sbr.rel (!%p12_p5) target bundleno = 1 (0x1), region = 82 }

// kernel: resnet_bloc_forward.7
= control target key start
LH: loop header
LB: loop body
LE: loop exit
PB: predicated region body
PF: predicated region fallthrough
CT: control target
= control target key end

     0   :  { %s570_s21 = smov 0   ;;  %s606_s0 = inlined_call_operand.vmem [shape: bf16[128,128], index: 0, kind: input, shape index: {}]   ;;  %s607_s1 = inlined_call_operand.vmem [shape: f32[2,1,128], index: 1, kind: input, shape index: {}]   ;;  %s608_s2 = inlined_call_operand.vmem [shape: f32[1,128], index: 2, kind: input, shape index: {}]   ;;  %s609_s3 = inlined_call_operand.vmem [shape: f32[1,128], index: 3, kind: input, shape index: {}]   ;;  %s610_s4 = inlined_call_operand.vmem [shape: f32[1,128], index: 4, kind: input, shape index: {}]   ;;  %s611_s5 = inlined_call_operand.vmem [shape: bf16[128,128], index: 5, kind: input, shape index: {}]   ;;  %s612_s6 = inlined_call_operand.vmem [shape: f32[128,128], index: 6, kind: output, shape index: {}]  }
   0x1 LB: > { %s464_s22 = sadd.s32 4294967295, %s533_s21   ;;  %p468_p0 = scmp.ge.s32.totalorder %s533_s21, 1  ;;  %s533_s21 = sphi %s570_s21, %s16_s21  }
   0x2   : > { %p232_p1 = scmp.lt.s32.totalorder %s533_s21, 3 }
   0x4   : > { %p233_p2 = pnand %p468_p0, %p232_p1 }
   0x5   : > { %s469_s23 = sshll.u32 (!%p233_p2), %s464_s22, 3  ;;  %p276_p3 = scmp.lt.s32.totalorder (!%p233_p2), %s464_s22, 1 }
   0x6   : > { %236 = sbr.rel (%p233_p2) target bundleno = 35 (0x23), region = 44  ;;  %p271_p4 = scmp.lt.s32.totalorder (!%p233_p2), %s469_s23, 15 }
   0xb   : > { %s614_s22 = smov (!%p276_p3, %s464_s22), 1  ;;  %s616_s23 = smov (!%p271_p4, %s469_s23), 15  ;;  %v524_v1 = vld [vmem:[%s608_s2] ss:$0 sm:$0xff] }
   0xc   : > { %s278_s26 = scalar_lea.vmem %s607_s1, %s614_s22  ;;  %s470_s27 = sshll.u32 %s616_s23, 2  ;;  %v525_v18 = vld [vmem:[%s609_s3] ss:$0 sm:$0xff] }
   0xd   : > { %s274_s30 = scalar_lea.vmem %s606_s0, %s470_s27  ;;  %s283_s9 = scalar_lea.vmem %s611_s5, %s470_s27  ;;  %v523_v0 = vld [vmem:[%s278_s26] ss:$0 sm:$0xff] }
   0xe   : > { %v478_v2 = vld [vmem:[%s274_s30] sm:$0xff]   ;;  %v509_v4 = vld [vmem:[%s274_s30 + $0x8] sm:$0xff]   ;;  %v510_v10 = vld [vmem:[%s274_s30 + $0x10] sm:$0xff]   ;;  %s474_s14 = sshll.u32 %s616_s23, 3 }
   0xf   : > { %v494_v3 = vld [vmem:[%s283_s9] sm:$0xff]   ;;  %v479_v5 = vunpack.c.l.bf16 %v478_v2  ;;  %v480_v7 = vunpack.c.h.bf16 %v478_v2  ;;  %v512_v9 = vld [vmem:[%s283_s9 + $0x8] sm:$0xff]   ;;  %v513_v11 = vld [vmem:[%s283_s9 + $0x10] sm:$0xff]   ;;  %v483_v12 = vunpack.c.l.bf16 %v509_v4  ;;  %v484_v14 = vunpack.c.h.bf16 %v509_v4  ;;  %s289_s19 = scalar_lea.vmem %s612_s6, %s474_s14 }
  0x10   : > { %v495_v6 = vunpack.c.l.bf16 %v494_v3  ;;  %v496_v8 = vunpack.c.h.bf16 %v494_v3  ;;  %v499_v13 = vunpack.c.l.bf16 %v512_v9  ;;  %v500_v15 = vunpack.c.h.bf16 %v512_v9  ;;  %v511_v16 = vld [vmem:[%s274_s30 + $0x18] sm:$0xff]   ;;  %v526_v36 = vld [vmem:[%s610_s4] ss:$0 sm:$0xff] }
  0x11   : > { %v311_v17 = vadd.f32 %v523_v0, %v479_v5  ;;  %v312_v19 = vadd.f32 %v523_v0, %v480_v7  ;;  %v487_v20 = vunpack.c.l.bf16 %v510_v10  ;;  %v503_v21 = vunpack.c.l.bf16 %v513_v11  ;;  %v514_v22 = vld [vmem:[%s283_s9 + $0x18] sm:$0xff]  }
  0x12   : > { %v313_v23 = vadd.f32 %v523_v0, %v483_v12  ;;  %v314_v24 = vadd.f32 %v523_v0, %v484_v14  ;;  %v488_v25 = vunpack.c.h.bf16 %v510_v10  ;;  %v504_v26 = vunpack.c.h.bf16 %v513_v11 }
  0x13   : > { %v323_v27 = vmul.f32 %v524_v1, %v311_v17  ;;  %v324_v28 = vmul.f32 %v524_v1, %v312_v19  ;;  %v315_v29 = vadd.f32 %v523_v0, %v487_v20  ;;  %v491_v30 = vunpack.c.l.bf16 %v511_v16 }
  0x14   : > { %v325_v31 = vmul.f32 %v524_v1, %v313_v23  ;;  %v326_v32 = vmul.f32 %v524_v1, %v314_v24  ;;  %v316_v33 = vadd.f32 %v523_v0, %v488_v25  ;;  %v507_v34 = vunpack.c.l.bf16 %v514_v22 }
  0x15   : > { %v335_v35 = vadd.f32 %v525_v18, %v323_v27  ;;  %v336_v37 = vadd.f32 %v525_v18, %v324_v28  ;;  %v327_v38 = vmul.f32 %v524_v1, %v315_v29  ;;  %v317_v39 = vadd.f32 %v523_v0, %v491_v30 }
  0x16   : > { %v337_v40 = vadd.f32 %v525_v18, %v325_v31  ;;  %v338_v41 = vadd.f32 %v525_v18, %v326_v32  ;;  %v328_v42 = vmul.f32 %v524_v1, %v316_v33  ;;  %v492_v43 = vunpack.c.h.bf16 %v511_v16 }
  0x17   : > { %v359_v44 = vadd.f32 %v495_v6, %v335_v35  ;;  %v360_v45 = vadd.f32 %v496_v8, %v336_v37  ;;  %v339_v46 = vadd.f32 %v525_v18, %v327_v38  ;;  %v329_v47 = vmul.f32 %v524_v1, %v317_v39 }
  0x18   : > { %v361_v48 = vadd.f32 %v499_v13, %v337_v40  ;;  %v362_v49 = vadd.f32 %v500_v15, %v338_v41  ;;  %v340_v50 = vadd.f32 %v525_v18, %v328_v42  ;;  %v318_v51 = vadd.f32 %v523_v0, %v492_v43 }
  0x19   : > { %v371_v52 = vmax.f32 %v359_v44, %v526_v36  ;;  %v372_v53 = vmax.f32 %v360_v45, %v526_v36  ;;  %v363_v54 = vadd.f32 %v503_v21, %v339_v46  ;;  %v341_v55 = vadd.f32 %v525_v18, %v329_v47 }
  0x1a   : > { %v373_v56 = vmax.f32 %v361_v48, %v526_v36  ;;  %v374_v57 = vmax.f32 %v362_v49, %v526_v36  ;;  %v364_v58 = vadd.f32 %v504_v26, %v340_v50  ;;  %v330_v59 = vmul.f32 %v524_v1, %v318_v51 }
  0x1b   : > { %379 = vst [vmem:[%s289_s19] sm:$0xff] %v371_v52  ;;  %v375_v60 = vmax.f32 %v363_v54, %v526_v36  ;;  %v365_v61 = vadd.f32 %v507_v34, %v341_v55  ;;  %v508_v62 = vunpack.c.h.bf16 %v514_v22 }
  0x1c   : > { %380 = vst [vmem:[%s289_s19 + $0x8] sm:$0xff] %v372_v53  ;;  %v376_v63 = vmax.f32 %v364_v58, %v526_v36  ;;  %v342_v2 = vadd.f32 %v525_v18, %v330_v59 }
  0x1d   : > { %381 = vst [vmem:[%s289_s19 + $0x10] sm:$0xff] %v373_v56  ;;  %v377_v3 = vmax.f32 %v365_v61, %v526_v36 }
  0x1e   : > { %382 = vst [vmem:[%s289_s19 + $0x18] sm:$0xff] %v374_v57  ;;  %v366_v4 = vadd.f32 %v508_v62, %v342_v2 }
  0x1f   : > { %383 = vst [vmem:[%s289_s19 + $0x20] sm:$0xff] %v375_v60 }
  0x20   : > { %384 = vst [vmem:[%s289_s19 + $0x28] sm:$0xff] %v376_v63  ;;  %v378_v0 = vmax.f32 %v366_v4, %v526_v36 }
  0x21   : > { %385 = vst [vmem:[%s289_s19 + $0x30] sm:$0xff] %v377_v3 }
  0x22   : > { %386 = vst [vmem:[%s289_s19 + $0x38] sm:$0xff] %v378_v0 }
  0x23 PF: > { %s16_s21 = sadd.s32 1, %s533_s21  }
  0x24   : > { %p13_p5 = scmp.ge.s32.totalorder %s16_s21, 4  }
  0x26   :  { %15 = sbr.rel (!%p13_p5) target bundleno = 1 (0x1), region = 80 }

</bundles_post_ra>
